<compile_context>
chip_gen: v5e
topology: v5e:2x2
jax: 0.10.0
libtpu: 0.0.40
codegen_flags: <defaults>
</compile_context>

<pallas_src>
import functools

import jax
import jax.numpy as jnp
from jax.experimental import pallas as pl
from jax.experimental.pallas import tpu as pltpu


_LANE = 128   # TPU lane width (last dim)
_SUB = 8      # sublane granularity for f32 (second-to-last dim)


def _round_up(v, m):
    return ((v + m - 1) // m) * m


def _fdgnn_kernel(x_ref, w1_ref, b1_ref, w2_ref, b2_ref, o_ref):
    # x_ref:  (TM, Cin)   f32  node-feature tile (cast to bf16 here, not in HBM)
    # w1_ref: (Cin, H)    bf16 resident across the grid
    # b1_ref: (1, H)      f32
    # w2_ref: (H, Cout)   f32  resident across the grid (tiny -> keep exact)
    # b2_ref: (1, Cout)   f32
    # o_ref:  (TM, Cout)  f32  (unpadded columns -> only real bytes hit HBM)
    x = x_ref[...].astype(jnp.bfloat16)           # in-kernel cast; hidden under DMA
    h = jnp.dot(x, w1_ref[...], preferred_element_type=jnp.float32)
    h = jnp.maximum(h + b1_ref[...], 0.0)         # bias + ReLU in f32 (VPU)
    y = jnp.dot(h, w2_ref[...], preferred_element_type=jnp.float32)
    o_ref[...] = (y + b2_ref[...]).astype(o_ref.dtype)


@functools.partial(jax.jit, static_argnames=("tile_m",))
def fdgnn_forward(x, edge_index, w1, b1, w2, b2, *, tile_m=1024):
    """Forward pass of ForgeryDetectionGNN. edge_index is unused (as in torch)."""
    del edge_index  # the reference forward never consumes it

    n, c_in = x.shape
    hidden = w1.shape[1]
    c_out = w2.shape[1]

    b1 = b1.reshape(1, hidden).astype(jnp.float32)
    b2 = b2.reshape(1, c_out).astype(jnp.float32)
    w1 = w1.astype(jnp.bfloat16)      # tiny; MXU-native operand for the big matmul
    w2 = w2.astype(jnp.float32)       # tiny second matmul stays exact f32

    # Only row-pad x when the node count is not sublane aligned; never touch the
    # feature dim (no wrapper-side padded/bf16 copy of x).
    n8 = _round_up(n, _SUB)
    xp = x.astype(jnp.float32)
    if n8 != n:
        xp = jnp.pad(xp, ((0, n8 - n), (0, 0)))

    # Node tile: large (amortize ~0.35us per-grid-step overhead) but capped so
    # the grid always has >= 2 blocks -> "parallel" can shard across v7x's 2 TCs.
    tm = max(_SUB, min(_round_up(tile_m, _SUB), _round_up(pl.cdiv(n8, 2), _SUB)))
    grid = (pl.cdiv(n8, tm),)   # partial last block is bounds-clamped by Pallas

    out = pl.pallas_call(
        _fdgnn_kernel,
        out_shape=jax.ShapeDtypeStruct((n8, c_out), jnp.float32),
        grid_spec=pltpu.PrefetchScalarGridSpec(
            num_scalar_prefetch=0,
            grid=grid,
            in_specs=[
                pl.BlockSpec((tm, c_in), lambda i: (i, 0)),       # x tile (f32)
                pl.BlockSpec((c_in, hidden), lambda i: (0, 0)),   # W1 (resident)
                pl.BlockSpec((1, hidden), lambda i: (0, 0)),      # b1
                pl.BlockSpec((hidden, c_out), lambda i: (0, 0)),  # W2 (resident)
                pl.BlockSpec((1, c_out), lambda i: (0, 0)),       # b2
            ],
            out_specs=pl.BlockSpec((tm, c_out), lambda i: (i, 0)),
        ),
        compiler_params=pltpu.CompilerParams(
            dimension_semantics=("parallel",),
            # No vmem_limit_bytes: working set (x tile + weights + out, double
            # buffered) is only a few MiB; leave the compiler headroom on v7x.
        ),
    )(xp, w1, b1, w2, b2)

    return out if n8 == n else out[:n]


def init_params(key, in_channels, hidden_dim, out_channels):
    """Deterministic synthetic parameters (shapes match nn.Linear, transposed)."""
    k1, k2, k3, k4 = jax.random.split(key, 4)
    # torch Linear weight is (out, in); we store the transpose (in, out).
    w1 = jax.random.normal(k1, (in_channels, hidden_dim), jnp.float32) * 0.05
    b1 = jax.random.normal(k2, (1, hidden_dim), jnp.float32) * 0.05
    w2 = jax.random.normal(k3, (hidden_dim, out_channels), jnp.float32) * 0.05
    b2 = jax.random.normal(k4, (1, out_channels), jnp.float32) * 0.05
    return w1, b1, w2, b2


if __name__ == "__main__":
    # Module defaults: in_channels=512, hidden_dim=128, out_channels=2.
    # num_nodes=200 deliberately exercises the non-divisible (partial-tile) path.
    num_nodes, in_channels, hidden_dim, out_channels = 200, 512, 128, 2

    key = jax.random.PRNGKey(0)
    kx, ke, kp = jax.random.split(key, 3)
    x = jax.random.normal(kx, (num_nodes, in_channels), jnp.float32)
    # edge_index exists for API parity with the PyTorch module (unused in forward).
    edge_index = jax.random.randint(ke, (2, 64), 0, num_nodes, jnp.int32)
    w1, b1, w2, b2 = init_params(kp, in_channels, hidden_dim, out_channels)

    out = fdgnn_forward(x, edge_index, w1, b1, w2, b2)
    out = jax.block_until_ready(out)
    assert out.shape == (num_nodes, out_channels)

    # Reference with the same operand rounding as the kernel (x, W1 in bf16 for
    # the first matmul; everything else f32) -> tight tolerance.
    xq = x.astype(jnp.bfloat16).astype(jnp.float32)
    w1q = w1.astype(jnp.bfloat16).astype(jnp.float32)
    h_ref = jnp.maximum(xq @ w1q + b1, 0.0)
    ref_q = h_ref @ w2 + b2
    assert jnp.allclose(out, ref_q, atol=1e-2, rtol=1e-2)

    # Full-precision PyTorch-forward reference -> loose tolerance for bf16 cast.
    ref = jnp.maximum(x @ w1 + b1, 0.0) @ w2 + b2
    assert jnp.allclose(out, ref, atol=5e-2, rtol=5e-2)

    print("KERNEL_OK")
</pallas_src>

<mosaic_0001>
module attributes {stable_mosaic.version = 11 : i64} {
  func.func @_fdgnn_kernel(%arg0: i32, %arg1: memref<104x512xf32, #tpu.memory_space<vmem>>, %arg2: memref<512x128xbf16, #tpu.memory_space<vmem>>, %arg3: memref<1x128xf32, #tpu.memory_space<vmem>>, %arg4: memref<128x2xf32, #tpu.memory_space<vmem>>, %arg5: memref<1x2xf32, #tpu.memory_space<vmem>>, %arg6: memref<104x2xf32, #tpu.memory_space<vmem>>) attributes {dimension_semantics = [#tpu.dimension_semantics<parallel>], iteration_bounds = array<i64: 2>, scalar_prefetch = 0 : i64, scratch_operands = 0 : i64, tpu.core_type = #tpu.core_type<tc>, window_params = [{transform_indices = @transform_0, window_bounds = array<i64: 104, 512>}, {pipeline_mode = #tpu.pipeline_mode<synchronous>, transform_indices = @transform_1, window_bounds = array<i64: 512, 128>}, {pipeline_mode = #tpu.pipeline_mode<synchronous>, transform_indices = @transform_2, window_bounds = array<i64: 1, 128>}, {pipeline_mode = #tpu.pipeline_mode<synchronous>, transform_indices = @transform_3, window_bounds = array<i64: 128, 2>}, {pipeline_mode = #tpu.pipeline_mode<synchronous>, transform_indices = @transform_4, window_bounds = array<i64: 1, 2>}, {transform_indices = @transform_5, window_bounds = array<i64: 104, 2>}]} {
    %c0 = arith.constant 0 : index
    %c0_0 = arith.constant 0 : index
    %0 = vector.load %arg1[%c0, %c0_0] : memref<104x512xf32, #tpu.memory_space<vmem>>, vector<104x512xf32>
    %1 = arith.truncf %0 : vector<104x512xf32> to vector<104x512xbf16>
    %c0_1 = arith.constant 0 : index
    %c0_2 = arith.constant 0 : index
    %2 = vector.load %arg2[%c0_1, %c0_2] : memref<512x128xbf16, #tpu.memory_space<vmem>>, vector<512x128xbf16>
    %cst = arith.constant dense<0.000000e+00> : vector<104x128xf32>
    %3 = tpu.matmul %1, %2, %cst {dimension_numbers = #tpu.dot_dimension_numbers<[1], [0], [0], [1], [0, 0, 1, 1], [], []>} : vector<104x512xbf16>, vector<512x128xbf16>, vector<104x128xf32> -> vector<104x128xf32>
    %c0_3 = arith.constant 0 : index
    %c0_4 = arith.constant 0 : index
    %4 = vector.load %arg3[%c0_3, %c0_4] : memref<1x128xf32, #tpu.memory_space<vmem>>, vector<1x128xf32>
    %5 = vector.broadcast %4 : vector<1x128xf32> to vector<104x128xf32>
    %6 = arith.addf %3, %5 : vector<104x128xf32>
    %cst_5 = arith.constant 0.000000e+00 : f32
    %7 = vector.broadcast %cst_5 : f32 to vector<104x128xf32>
    %8 = arith.maximumf %6, %7 : vector<104x128xf32>
    %c0_6 = arith.constant 0 : index
    %c0_7 = arith.constant 0 : index
    %9 = vector.load %arg4[%c0_6, %c0_7] : memref<128x2xf32, #tpu.memory_space<vmem>>, vector<128x2xf32>
    %cst_8 = arith.constant dense<0.000000e+00> : vector<104x2xf32>
    %10 = tpu.matmul %8, %9, %cst_8 {dimension_numbers = #tpu.dot_dimension_numbers<[1], [0], [0], [1], [0, 0, 1, 1], [], []>} : vector<104x128xf32>, vector<128x2xf32>, vector<104x2xf32> -> vector<104x2xf32>
    %c0_9 = arith.constant 0 : index
    %c0_10 = arith.constant 0 : index
    %11 = vector.load %arg5[%c0_9, %c0_10] : memref<1x2xf32, #tpu.memory_space<vmem>>, vector<1x2xf32>
    %12 = vector.broadcast %11 : vector<1x2xf32> to vector<104x2xf32>
    %13 = arith.addf %10, %12 : vector<104x2xf32>
    %c0_11 = arith.constant 0 : index
    %c0_12 = arith.constant 0 : index
    %14 = vector.load %arg6[%c0_11, %c0_12] : memref<104x2xf32, #tpu.memory_space<vmem>>, vector<104x2xf32>
    tpu.vector_store %arg6[%c0_11, %c0_12], %13 {strides = array<i32>} : memref<104x2xf32, #tpu.memory_space<vmem>>, vector<104x2xf32>,
    return
  }
  func.func @transform_0(%arg0: i32) -> (i32, i32) {
    %c0_i32 = arith.constant 0 : i32
    %c0_i32_0 = arith.constant 0 : i32
    return %arg0, %c0_i32 : i32, i32
  }
  func.func @transform_1(%arg0: i32) -> (i32, i32) {
    %c0_i32 = arith.constant 0 : i32
    %c0_i32_0 = arith.constant 0 : i32
    %c0_i32_1 = arith.constant 0 : i32
    return %c0_i32, %c0_i32_0 : i32, i32
  }
  func.func @transform_2(%arg0: i32) -> (i32, i32) {
    %c0_i32 = arith.constant 0 : i32
    %c0_i32_0 = arith.constant 0 : i32
    %c0_i32_1 = arith.constant 0 : i32
    return %c0_i32, %c0_i32_0 : i32, i32
  }
  func.func @transform_3(%arg0: i32) -> (i32, i32) {
    %c0_i32 = arith.constant 0 : i32
    %c0_i32_0 = arith.constant 0 : i32
    %c0_i32_1 = arith.constant 0 : i32
    return %c0_i32, %c0_i32_0 : i32, i32
  }
  func.func @transform_4(%arg0: i32) -> (i32, i32) {
    %c0_i32 = arith.constant 0 : i32
    %c0_i32_0 = arith.constant 0 : i32
    %c0_i32_1 = arith.constant 0 : i32
    return %c0_i32, %c0_i32_0 : i32, i32
  }
  func.func @transform_5(%arg0: i32) -> (i32, i32) {
    %c0_i32 = arith.constant 0 : i32
    %c0_i32_0 = arith.constant 0 : i32
    return %arg0, %c0_i32 : i32, i32
  }
}

</mosaic_0001>

<bundles_post_ra>
// kernel: fdgnn_forward.1
= control target key start
LH: loop header
LB: loop body
LE: loop exit
PB: predicated region body
PF: predicated region fallthrough
CT: control target
= control target key end

     0   :  { %s1555_s18 = smov 0   ;;  %s1557_s19 = smov 0   ;;  %s1960_s0 = inlined_call_operand.vmem [shape: f32[200,512], index: 0, kind: input, shape index: {}]   ;;  %s1961_s1 = inlined_call_operand.vmem [shape: bf16[512,128], index: 1, kind: input, shape index: {}]   ;;  %s1962_s2 = inlined_call_operand.vmem [shape: f32[1,128], index: 2, kind: input, shape index: {}]   ;;  %s1963_s3 = inlined_call_operand.vmem [shape: f32[128,2], index: 3, kind: input, shape index: {}]   ;;  %s1964_s4 = inlined_call_operand.vmem [shape: f32[1,2], index: 4, kind: input, shape index: {}]   ;;  %s1965_s5 = inlined_call_operand.vmem [shape: f32[200,2], index: 5, kind: output, shape index: {}]  }
   0x1   :  { %s1559_s20 = smov 0  }
   0x2 LB: > { %s1568_s21 = sadd.s32 4294967295, %s1491_s20   ;;  %s1570_s22 = sadd.s32 1, %s1491_s20   ;;  %s1491_s20 = sphi %s1559_s20, %s1974_s20   ;;  %s1487_s19 = sphi %s1557_s19, %s1973_s19   ;;  %s1483_s18 = sphi %s1555_s18, %s1972_s18  }
   0x3   : > { %s129_s23 = ssub.s32 %s1491_s20, %s1570_s22  ;;  %s132_s24 = sadd.s32 1, %s1487_s19 }
   0x4   : > { %p130_p0 = scmp.eq.s32.totalorder %s129_s23, 0  ;;  %p142_p1 = scmp.ne.s32.totalorder %s1487_s19, %s1483_s18 }
   0x5   : > { %p143_p2 = scmp.eq.s32.totalorder %s1568_s21, 1  ;;  %p1138_p3 = scmp.ge.s32.totalorder %s1491_s20, 1 }
   0x6   : > { %s1578_s25 = scalar_select %p130_p0, %s1487_s19, %s132_s24  }
   0x7   : > { %p1580_p4 = por %p143_p2, %p142_p1  ;;  %p199_p5 = scmp.lt.s32.totalorder %s1491_s20, 3 }
   0x9   : > { %p200_p6 = pnand %p1138_p3, %p199_p5 }
   0xa   : > { %s1594_s8 = smul.u32 (!%p200_p6), 13, %s1568_s21  ;;  %s229_s23 = sand.u32 (!%p200_p6), 1, %s1483_s18  }
   0xb   : > { %203 = sbr.rel (%p200_p6) target bundleno = 503 (0x1f7), region = 40 }
   0xc   : > { %p238_p7 = scmp.lt.s32.totalorder (!%p200_p6), %s1594_s8, 24  ;;  %s1339_s24 = smul.u32 (!%p200_p6), 104, %s229_s23 }
   0xe   : > { %s1839_s30 = scalar_lea.vmem (!%p200_p6), [#allocation2], %s1339_s24  }
  0x10   : > { %v1289_v0 = vld [vmem:[%s1961_s1 + $0x38] sm:$0xff]  ;;  %v1288_v1 = vld [vmem:[%s1961_s1 + $0x30] sm:$0xff]  ;;  %v1287_v2 = vld [vmem:[%s1961_s1 + $0x28] sm:$0xff]  ;;  %s239_s13 = scalar_select %p238_p7, %s1594_s8, 24  ;;  %vm855_vm0 = vcmask 15360  }
  0x11   : > { %1315 = vmatpush.bf16.msra.mxu1 %v1289_v0  ;;  %1316 = vmatpush.bf16.msra.mxu2 %v1289_v0  ;;  %v1286_v3 = vld [vmem:[%s1961_s1 + $0x20] sm:$0xff]  ;;  %v1285_v4 = vld [vmem:[%s1961_s1 + $0x18] sm:$0xff]  ;;  %v1284_v5 = vld [vmem:[%s1961_s1 + $0x10] sm:$0xff]  ;;  %s877_s18 = ssub.s32 (%p1580_p4), 25, %s1594_s8  ;;  %s1314_s6 = smul.u32 (%p1580_p4), 104, %s1568_s21 }
  0x12   : > { %1317 = vmatpush.bf16.msra.mxu3 %v1289_v0  ;;  %594 = vmatpush.bf16.msra.mxu0 %v1289_v0  ;;  %s1281_s16 = sshll.u32 %s239_s13, 5  ;;  %v1283_v6 = vld [vmem:[%s1961_s1 + $0x8] sm:$0xff]  ;;  %v1282_v7 = vld [vmem:[%s1961_s1] sm:$0xff]  ;;  %v1305_v12 = vld [vmem:[%s1961_s1 + $0xb8] sm:$0xff]  ;;  %p878_p8 = scmp.lt.s32.totalorder (%p1580_p4), %s877_s18, 13 }
  0x13   : > { %s1613_s27 = scalar_lea.vmem %s1960_s0, %s1281_s16  ;;  %v1313_v14 = vld [vmem:[%s1961_s1 + $0xf8] sm:$0xff]  ;;  %v1304_v21 = vld [vmem:[%s1961_s1 + $0xb0] sm:$0xff]  ;;  %v1303_v25 = vld [vmem:[%s1961_s1 + $0xa8] sm:$0xff]  ;;  %s1874_s9 = scalar_lea.vmem (%p1580_p4), %s1965_s5, %s1314_s6  }
  0x14   : > { %v270_v8 = vld [vmem:[%s1613_s27 + $0x80] sm:$0xff]  ;;  %v1297_v15 = vld [vmem:[%s1961_s1 + $0x78] sm:$0xff]  ;;  %v1312_v22 = vld [vmem:[%s1961_s1 + $0xf0] sm:$0xff] }
  0x15   : > { %1318 = vmatpush.bf16.msra.mxu1 %v1288_v1  ;;  %1319 = vmatpush.bf16.msra.mxu2 %v1288_v1  ;;  %v274_v9 = vld [vmem:[%s1613_s27 + $0xa0] sm:$0xff]  ;;  %v1296_v23 = vld [vmem:[%s1961_s1 + $0x70] sm:$0xff]  ;;  %v1311_v26 = vld [vmem:[%s1961_s1 + $0xe8] sm:$0xff] }
  0x16   : > { %1320 = vmatpush.bf16.msra.mxu3 %v1288_v1  ;;  %595 = vmatpush.bf16.msra.mxu0 %v1288_v1  ;;  %v286_v10 = vld [vmem:[%s1613_s27 + $0x100] sm:$0xff]  ;;  %v314_v16 = vpack.c.bf16 %v274_v9, %v270_v8  ;;  %v1295_v27 = vld [vmem:[%s1961_s1 + $0x68] sm:$0xff]  ;;  %v1301_v35 = vld [vmem:[%s1961_s1 + $0x98] sm:$0xff] }
  0x17   : > { %v290_v11 = vld [vmem:[%s1613_s27 + $0x120] sm:$0xff]  ;;  %v1309_v36 = vld [vmem:[%s1961_s1 + $0xd8] sm:$0xff]  ;;  %v1300_v42 = vld [vmem:[%s1961_s1 + $0x90] sm:$0xff] }
  0x18   : > { %v302_v13 = vld [vmem:[%s1613_s27 + $0x180] sm:$0xff]  ;;  %v322_v17 = vpack.c.bf16 %v290_v11, %v286_v10  ;;  %v1293_v37 = vld [vmem:[%s1961_s1 + $0x58] sm:$0xff]  ;;  %v1308_v43 = vld [vmem:[%s1961_s1 + $0xd0] sm:$0xff] }
  0x19   : > { %1321 = vmatpush.bf16.msra.mxu1 %v1287_v2  ;;  %1322 = vmatpush.bf16.msra.mxu2 %v1287_v2  ;;  %v330_v18 = vpack.c.bf16 %v302_v13, %v302_v13  ;;  %v254_v19 = vld [vmem:[%s1613_s27] sm:$0xff]  ;;  %v1292_v44 = vld [vmem:[%s1961_s1 + $0x50] sm:$0xff]  ;;  %v1299_v46 = vld [vmem:[%s1961_s1 + $0x88] sm:$0xff] }
  0x1a   : > { %1323 = vmatpush.bf16.msra.mxu3 %v1287_v2  ;;  %596 = vmatpush.bf16.msra.mxu0 %v1287_v2  ;;  %v258_v20 = vld [vmem:[%s1613_s27 + $0x20] sm:$0xff]  ;;  %v1307_v47 = vld [vmem:[%s1961_s1 + $0xc8] sm:$0xff]  ;;  %v257_v52 = vld [vmem:[%s1613_s27 + $0x18] sm:$0xff] }
  0x1b   : > { %v306_v24 = vpack.c.bf16 %v258_v20, %v254_v19  ;;  %v1302_v28 = vld [vmem:[%s1961_s1 + $0xa0] sm:$0xff]  ;;  %v1291_v48 = vld [vmem:[%s1961_s1 + $0x48] sm:$0xff]  ;;  %v261_v53 = vld [vmem:[%s1613_s27 + $0x38] sm:$0xff] }
  0x1c   : > { %v1310_v29 = vld [vmem:[%s1961_s1 + $0xe0] sm:$0xff]  ;;  %v255_v54 = vld [vmem:[%s1613_s27 + $0x8] sm:$0xff]  ;;  %v256_v56 = vld [vmem:[%s1613_s27 + $0x10] sm:$0xff]  ;;  %v309_v58 = vpack.c.bf16 %v261_v53, %v257_v52 }
  0x1d   : > { %1324 = vmatpush.bf16.msra.mxu1 %v1286_v3  ;;  %1325 = vmatpush.bf16.msra.mxu2 %v1286_v3  ;;  %v1294_v30 = vld [vmem:[%s1961_s1 + $0x60] sm:$0xff]  ;;  %v259_v55 = vld [vmem:[%s1613_s27 + $0x28] sm:$0xff]  ;;  %v260_v57 = vld [vmem:[%s1613_s27 + $0x30] sm:$0xff] }
  0x1e   : > { %1326 = vmatpush.bf16.msra.mxu3 %v1286_v3  ;;  %597 = vmatpush.bf16.msra.mxu0 %v1286_v3  ;;  %v278_v31 = vld [vmem:[%s1613_s27 + $0xc0] sm:$0xff]  ;;  %v307_v59 = vpack.c.bf16 %v259_v55, %v255_v54  ;;  %v308_v60 = vpack.c.bf16 %v260_v57, %v256_v56  ;;  %v265_v61 = vld [vmem:[%s1613_s27 + $0x58] sm:$0xff]  ;;  %v263_v63 = vld [vmem:[%s1613_s27 + $0x48] sm:$0xff] }
  0x1f   : > { %v282_v32 = vld [vmem:[%s1613_s27 + $0xe0] sm:$0xff]  ;;  %v269_v62 = vld [vmem:[%s1613_s27 + $0x78] sm:$0xff]  ;;  %v267_v0 = vld [vmem:[%s1613_s27 + $0x68] sm:$0xff] }
  0x20   : > { %v294_v33 = vld [vmem:[%s1613_s27 + $0x140] sm:$0xff]  ;;  %v318_v38 = vpack.c.bf16 %v282_v32, %v278_v31  ;;  %v264_v1 = vld [vmem:[%s1613_s27 + $0x50] sm:$0xff]  ;;  %v313_v3 = vpack.c.bf16 %v269_v62, %v265_v61  ;;  %v271_v8 = vld [vmem:[%s1613_s27 + $0x88] sm:$0xff] }
  0x21   : > { %1327 = vmatpush.bf16.msra.mxu1 %v1285_v4  ;;  %1328 = vmatpush.bf16.msra.mxu2 %v1285_v4  ;;  %v298_v34 = vld [vmem:[%s1613_s27 + $0x160] sm:$0xff]  ;;  %v268_v2 = vld [vmem:[%s1613_s27 + $0x70] sm:$0xff]  ;;  %v275_v9 = vld [vmem:[%s1613_s27 + $0xa8] sm:$0xff] }
  0x22   : > { %1329 = vmatpush.bf16.msra.mxu3 %v1285_v4  ;;  %598 = vmatpush.bf16.msra.mxu0 %v1285_v4  ;;  %v326_v39 = vpack.c.bf16 %v298_v34, %v294_v33  ;;  %v262_v40 = vld [vmem:[%s1613_s27 + $0x40] sm:$0xff]  ;;  %v311_v4 = vpack.c.bf16 %v267_v0, %v263_v63  ;;  %v272_v10 = vld [vmem:[%s1613_s27 + $0x90] sm:$0xff]  ;;  %v315_v13 = vpack.c.bf16 %v275_v9, %v271_v8  ;;  %v794_v33 = vld [vmem:[%s1963_s3 + $0x78] sm:$0xff] }
  0x23   : > { %v266_v41 = vld [vmem:[%s1613_s27 + $0x60] sm:$0xff]  ;;  %v276_v11 = vld [vmem:[%s1613_s27 + $0xb0] sm:$0xff]  ;;  %v297_v34 = vld [vmem:[%s1613_s27 + $0x158] sm:$0xff] }
  0x24   : > { %v310_v45 = vpack.c.bf16 %v266_v41, %v262_v40  ;;  %v1306_v49 = vld [vmem:[%s1961_s1 + $0xc0] sm:$0xff]  ;;  %v280_v19 = vld [vmem:[%s1613_s27 + $0xd0] sm:$0xff]  ;;  %v303_v52 = vld [vmem:[%s1613_s27 + $0x188] sm:$0xff] }
  0x25   : > { %1330 = vmatpush.bf16.msra.mxu1 %v1284_v5  ;;  %1331 = vmatpush.bf16.msra.mxu2 %v1284_v5  ;;  %v1298_v50 = vld [vmem:[%s1961_s1 + $0x80] sm:$0xff]  ;;  %v284_v20 = vld [vmem:[%s1613_s27 + $0xf0] sm:$0xff]  ;;  %v331_v55 = vpack.c.bf16 %v303_v52, %v303_v52  ;;  %v782_v61 = vld [vmem:[%s1963_s3 + $0x18] sm:$0xff] }
  0x26   : > { %1332 = vmatpush.bf16.msra.mxu3 %v1284_v5  ;;  %599 = vmatpush.bf16.msra.mxu0 %v1284_v5  ;;  %v1290_v51 = vld [vmem:[%s1961_s1 + $0x40] sm:$0xff]  ;;  %v312_v5 = vpack.c.bf16 %v268_v2, %v264_v1  ;;  %v304_v53 = vld [vmem:[%s1613_s27 + $0x190] sm:$0xff] }
  0x27   : > { %v332_v56 = vpack.c.bf16 %v304_v53, %v304_v53  ;;  %v785_v57 = vld [vmem:[%s1963_s3 + $0x30] sm:$0xff]  ;;  %v1786_v62 = vld [vmem:[%s1962_s2] ss:$0 sm:$0xff] }
  0x29   : > { %1333 = vmatpush.bf16.msra.mxu1 %v1283_v6  ;;  %1334 = vmatpush.bf16.msra.mxu2 %v1283_v6 }
  0x2a   : > { %1335 = vmatpush.bf16.msra.mxu3 %v1283_v6  ;;  %600 = vmatpush.bf16.msra.mxu0 %v1283_v6  ;;  %v273_v6 = vld [vmem:[%s1613_s27 + $0x98] sm:$0xff] }
  0x2d   : > { %1336 = vmatpush.bf16.msra.mxu1 %v1282_v7  ;;  %1337 = vmatpush.bf16.msra.mxu2 %v1282_v7 }
  0x2e   : > { %1338 = vmatpush.bf16.msra.mxu3 %v1282_v7  ;;  %601 = vmatpush.bf16.msra.mxu0 %v1282_v7  ;;  %v277_v7 = vld [vmem:[%s1613_s27 + $0xb8] sm:$0xff] }
  0x30   : > { %612 = vmatmul.bf16.vlgmr.msra.gmra.mxu1 %v314_v16  ;;  %622 = vmatmul.bf16.vlgmr.msra.gmra.mxu2 %v322_v17  ;;  %v285_v16 = vld [vmem:[%s1613_s27 + $0xf8] sm:$0xff]  ;;  %v279_v17 = vld [vmem:[%s1613_s27 + $0xc8] sm:$0xff] }
  0x31   : > { %680 = vmatpush.bf16.msrb.mxu2 %v1305_v12  ;;  %637 = vmatpush.bf16.msrb.mxu1 %v1297_v15  ;;  %v317_v12 = vpack.c.bf16 %v277_v7, %v273_v6  ;;  %v281_v15 = vld [vmem:[%s1613_s27 + $0xd8] sm:$0xff]  ;;  %v779_v6 = vld [vmem:[%s1963_s3] sm:$0xff] }
  0x32   : > { %723 = vmatpush.bf16.msrb.mxu3 %v1313_v14  ;;  %602 = vmatmul.bf16.vlgmr.msra.gmra.mxu0 %v306_v24  ;;  %v316_v14 = vpack.c.bf16 %v276_v11, %v272_v10  ;;  %v289_v24 = vld [vmem:[%s1613_s27 + $0x118] sm:$0xff] }
  0x33   : > { %632 = vmatmul.bf16.vlgmr.msra.gmra.mxu3 %v330_v18  ;;  %v283_v18 = vld [vmem:[%s1613_s27 + $0xe8] sm:$0xff]  ;;  %799 = vmatpush.msrb.mxu0 %v794_v33 }
  0x35   : > { %681 = vmatpush.bf16.msrb.mxu2 %v1304_v21  ;;  %638 = vmatpush.bf16.msrb.mxu1 %v1296_v23  ;;  %v321_v21 = vpack.c.bf16 %v285_v16, %v281_v15  ;;  %v320_v23 = vpack.c.bf16 %v284_v20, %v280_v19 }
  0x36   : > { %724 = vmatpush.bf16.msrb.mxu3 %v1312_v22  ;;  %v319_v22 = vpack.c.bf16 %v283_v18, %v279_v17 }
  0x39   : > { %682 = vmatpush.bf16.msrb.mxu2 %v1303_v25  ;;  %639 = vmatpush.bf16.msrb.mxu1 %v1295_v27  ;;  %v293_v25 = vld [vmem:[%s1613_s27 + $0x138] sm:$0xff]  ;;  %v291_v27 = vld [vmem:[%s1613_s27 + $0x128] sm:$0xff] }
  0x3a   : > { %725 = vmatpush.bf16.msrb.mxu3 %v1311_v26  ;;  %v287_v26 = vld [vmem:[%s1613_s27 + $0x108] sm:$0xff] }
  0x3b   : > { %v323_v31 = vpack.c.bf16 %v291_v27, %v287_v26 }
  0x3d   : > { %683 = vmatpush.bf16.msrb.mxu2 %v1302_v28  ;;  %640 = vmatpush.bf16.msrb.mxu1 %v1294_v30  ;;  %v288_v28 = vld [vmem:[%s1613_s27 + $0x110] sm:$0xff]  ;;  %v325_v30 = vpack.c.bf16 %v293_v25, %v289_v24 }
  0x3e   : > { %726 = vmatpush.bf16.msrb.mxu3 %v1310_v29  ;;  %v292_v29 = vld [vmem:[%s1613_s27 + $0x130] sm:$0xff] }
  0x3f   : > { %v324_v32 = vpack.c.bf16 %v292_v29, %v288_v28 }
  0x40   : > { %617 = vmatmul.bf16.gmra.mxu1 %v318_v38  ;;  %627 = vmatmul.bf16.gmra.mxu2 %v326_v39  ;;  %v296_v38 = vld [vmem:[%s1613_s27 + $0x150] sm:$0xff] }
  0x41   : > { %684 = vmatpush.bf16.msrb.mxu2 %v1301_v35  ;;  %641 = vmatpush.bf16.msrb.mxu1 %v1293_v37  ;;  %v301_v35 = vld [vmem:[%s1613_s27 + $0x178] sm:$0xff]  ;;  %v299_v37 = vld [vmem:[%s1613_s27 + $0x168] sm:$0xff]  ;;  %v300_v39 = vld [vmem:[%s1613_s27 + $0x170] sm:$0xff] }
  0x42   : > { %727 = vmatpush.bf16.msrb.mxu3 %v1309_v36  ;;  %607 = vmatmul.bf16.gmra.mxu0 %v310_v45  ;;  %v295_v36 = vld [vmem:[%s1613_s27 + $0x148] sm:$0xff]  ;;  %v329_v40 = vpack.c.bf16 %v301_v35, %v297_v34  ;;  %v791_v45 = vld [vmem:[%s1963_s3 + $0x60] sm:$0xff] }
  0x43   : > { %v327_v41 = vpack.c.bf16 %v299_v37, %v295_v36 }
  0x45   : > { %685 = vmatpush.bf16.msrb.mxu2 %v1300_v42  ;;  %642 = vmatpush.bf16.msrb.mxu1 %v1292_v44  ;;  %v328_v42 = vpack.c.bf16 %v300_v39, %v296_v38  ;;  %v792_v44 = vld [vmem:[%s1963_s3 + $0x68] sm:$0xff] }
  0x46   : > { %728 = vmatpush.bf16.msrb.mxu3 %v1308_v43  ;;  %v793_v43 = vld [vmem:[%s1963_s3 + $0x70] sm:$0xff] }
  0x47   : > { %800 = vmatpush.msrb.mxu0 %v793_v43 }
  0x49   : > { %686 = vmatpush.bf16.msrb.mxu2 %v1299_v46  ;;  %643 = vmatpush.bf16.msrb.mxu1 %v1291_v48  ;;  %v790_v46 = vld [vmem:[%s1963_s3 + $0x58] sm:$0xff]  ;;  %v788_v48 = vld [vmem:[%s1963_s3 + $0x48] sm:$0xff] }
  0x4a   : > { %729 = vmatpush.bf16.msrb.mxu3 %v1307_v47  ;;  %801 = vmatpush.msrb.mxu0 %v792_v44  ;;  %v789_v47 = vld [vmem:[%s1963_s3 + $0x50] sm:$0xff] }
  0x4c   : > { %802 = vmatpush.msrb.mxu0 %v791_v45 }
  0x4d   : > { %687 = vmatpush.bf16.msrb.mxu2 %v1298_v50  ;;  %644 = vmatpush.bf16.msrb.mxu1 %v1290_v51  ;;  %v305_v50 = vld [vmem:[%s1613_s27 + $0x198] sm:$0xff] }
  0x4e   : > { %730 = vmatpush.bf16.msrb.mxu3 %v1306_v49  ;;  %803 = vmatpush.msrb.mxu0 %v790_v46  ;;  %v787_v49 = vld [vmem:[%s1963_s3 + $0x40] sm:$0xff]  ;;  %v786_v51 = vld [vmem:[%s1963_s3 + $0x38] sm:$0xff]  ;;  %v333_v54 = vpack.c.bf16 %v305_v50, %v305_v50 }
  0x50   : > { %645 = vmatmul.bf16.vlgmr.msrb.gmra.mxu1 %v307_v59  ;;  %688 = vmatmul.bf16.vlgmr.msrb.gmra.mxu2 %v308_v60  ;;  %v784_v59 = vld [vmem:[%s1963_s3 + $0x28] sm:$0xff]  ;;  %v783_v60 = vld [vmem:[%s1963_s3 + $0x20] sm:$0xff] }
  0x51   : > { %731 = vmatmul.bf16.vlgmr.msrb.gmra.mxu3 %v309_v58  ;;  %804 = vmatpush.msrb.mxu0 %v789_v47 }
  0x53   : > { %805 = vmatpush.msrb.mxu0 %v788_v48 }
  0x55   : > { %806 = vmatpush.msrb.mxu0 %v787_v49 }
  0x57   : > { %807 = vmatpush.msrb.mxu0 %v786_v51 }
  0x59   : > { %808 = vmatpush.msrb.mxu0 %v785_v57 }
  0x5b   : > { %809 = vmatpush.msrb.mxu0 %v784_v59 }
  0x5d   : > { %810 = vmatpush.msrb.mxu0 %v783_v60 }
  0x5f   : > { %811 = vmatpush.msrb.mxu0 %v782_v61 }
  0x60   : > { %650 = vmatmul.bf16.gmra.mxu1 %v311_v4  ;;  %693 = vmatmul.bf16.gmra.mxu2 %v312_v5  ;;  %v781_v4 = vld [vmem:[%s1963_s3 + $0x10] sm:$0xff]  ;;  %v780_v5 = vld [vmem:[%s1963_s3 + $0x8] sm:$0xff] }
  0x61   : > { %736 = vmatmul.bf16.gmra.mxu3 %v313_v3  ;;  %812 = vmatpush.msrb.mxu0 %v781_v4 }
  0x63   : > { %813 = vmatpush.msrb.mxu0 %v780_v5 }
  0x65   : > { %814 = vmatpush.msrb.mxu0 %v779_v6 }
  0x70   : > { %655 = vmatmul.bf16.gmra.mxu1 %v315_v13  ;;  %698 = vmatmul.bf16.gmra.mxu2 %v316_v14 }
  0x71   : > { %741 = vmatmul.bf16.gmra.mxu3 %v317_v12 }
  0x80   : > { %660 = vmatmul.bf16.gmra.mxu1 %v319_v22  ;;  %703 = vmatmul.bf16.gmra.mxu2 %v320_v23 }
  0x81   : > { %746 = vmatmul.bf16.gmra.mxu3 %v321_v21 }
  0x90   : > { %665 = vmatmul.bf16.gmra.mxu1 %v323_v31  ;;  %708 = vmatmul.bf16.gmra.mxu2 %v324_v32 }
  0x91   : > { %751 = vmatmul.bf16.gmra.mxu3 %v325_v30 }
  0xa0   : > { %670 = vmatmul.bf16.gmra.mxu1 %v327_v41  ;;  %713 = vmatmul.bf16.gmra.mxu2 %v328_v42 }
  0xa1   : > { %756 = vmatmul.bf16.gmra.mxu3 %v329_v40 }
  0xad   : > { %v1772_v58 = vpop.f32.mrf.mxu1 }
  0xae   : > { %v614_v52 = vadd.f32 %v1786_v62, %v1772_v58 }
  0xaf   : > { %v603_v14 = vpop.f32.mrf.mxu0 }
  0xb0   : > { %675 = vmatmul.bf16.gmra.mxu1 %v331_v55  ;;  %718 = vmatmul.bf16.gmra.mxu2 %v332_v56  ;;  %v604_v16 = vadd.f32 %v1786_v62, %v603_v14 }
  0xb1   : > { %761 = vmatmul.bf16.gmra.mxu3 %v333_v54 }
  0xb3   : > { %v623_v63 = vpop.f32.mrf.mxu2 }
  0xb4   : > { %v1789_v0 = vadd.f32 %v1786_v62, %v623_v63 }
  0xb5   : > { %v1791_v2 = vpop.f32.mrf.mxu1 }
  0xb6   : > { %v633_v1 = vpop.f32.mrf.mxu3  ;;  %v616_v61 = vadd.f32 %v1786_v62, %v1791_v2 }
  0xb7   : > { %v1794_v3 = vadd.f32 %v1786_v62, %v633_v1  ;;  %v605_v20 = vpop.f32.mrf.mxu0 }
  0xb8   : > { %v606_v26 = vadd.f32 %v1786_v62, %v605_v20 }
  0xbb   : > { %v625_v7 = vpop.f32.mrf.mxu2 }
  0xbc   : > { %v1806_v8 = vadd.f32 %v1786_v62, %v625_v7 }
  0xbd   : > { %v1808_v10 = vpop.f32.mrf.mxu1 }
  0xbe   : > { %v635_v9 = vpop.f32.mrf.mxu3  ;;  %v619_v58 = vadd.f32 %v1786_v62, %v1808_v10 }
  0xbf   : > { %v608_v30 = vpop.f32.mrf.mxu0 }
  0xc0   : > { %v609_v32 = vadd.f32 %v1786_v62, %v608_v30 }
  0xc3   : > { %v628_v11 = vpop.f32.mrf.mxu2 }
  0xc4   : > { %v1811_v12 = vadd.f32 %v1786_v62, %v628_v11 }
  0xc5   : > { %v1813_v13 = vpop.f32.mrf.mxu1 }
  0xc6   : > { %v621_v2 = vadd.f32 %v1786_v62, %v1813_v13 }
  0xc7   : > { %v610_v41 = vpop.f32.mrf.mxu0 }
  0xc8   : > { %v611_v44 = vadd.f32 %v1786_v62, %v610_v41 }
  0xcb   : > { %v630_v15 = vpop.f32.mrf.mxu2 }
  0xcc   : > { %v1817_v17 = vadd.f32 %v1786_v62, %v630_v15 }
  0xcd   : > { %v646_v18 = vpop.f32.mrf.mxu1 }
  0xce   : > { %v647_v19 = vadd.f32 %v646_v18, %v604_v16 }
  0xd3   : > { %v689_v22 = vpop.f32.mrf.mxu2 }
  0xd4   : > { %v732_v21 = vpop.f32.mrf.mxu3  ;;  %v690_v23 = vadd.f32 %v689_v22, %v647_v19 }
  0xd5   : > { %v648_v24 = vpop.f32.mrf.mxu1 }
  0xd6   : > { %v733_v25 = vadd.f32 %v732_v21, %v690_v23  ;;  %v649_v29 = vadd.f32 %v648_v24, %v606_v26 }
  0xd8   : > { %v766_v27 = vmax.f32 %v733_v25, 0.0 }
  0xda   : > { %815 = vmatmul.f32.vlgmr.msrb.gmra.mxu0 %v766_v27 }
  0xdb   : > { %v691_v31 = vpop.f32.mrf.mxu2 }
  0xdc   : > { %v734_v28 = vpop.f32.mrf.mxu3  ;;  %v692_v33 = vadd.f32 %v691_v31, %v649_v29 }
  0xdd   : > { %v651_v34 = vpop.f32.mrf.mxu1 }
  0xde   : > { %v735_v35 = vadd.f32 %v734_v28, %v692_v33  ;;  %v652_v36 = vadd.f32 %v651_v34, %v609_v32 }
  0xe0   : > { %v767_v37 = vmax.f32 %v735_v35, 0.0 }
  0xe2   : > { %818 = vmatmul.f32.gmra.mxu0 %v767_v37 }
  0xe3   : > { %v694_v39 = vpop.f32.mrf.mxu2 }
  0xe4   : > { %v737_v38 = vpop.f32.mrf.mxu3  ;;  %v695_v40 = vadd.f32 %v694_v39, %v652_v36 }
  0xe5   : > { %v653_v42 = vpop.f32.mrf.mxu1 }
  0xe6   : > { %v738_v43 = vadd.f32 %v737_v38, %v695_v40  ;;  %v654_v47 = vadd.f32 %v653_v42, %v611_v44 }
  0xe8   : > { %v768_v45 = vmax.f32 %v738_v43, 0.0 }
  0xea   : > { %821 = vmatmul.f32.gmra.mxu0 %v768_v45 }
  0xeb   : > { %v696_v48 = vpop.f32.mrf.mxu2 }
  0xec   : > { %v739_v46 = vpop.f32.mrf.mxu3  ;;  %v697_v49 = vadd.f32 %v696_v48, %v654_v47 }
  0xed   : > { %v656_v50 = vpop.f32.mrf.mxu1 }
  0xee   : > { %v740_v51 = vadd.f32 %v739_v46, %v697_v49  ;;  %v657_v55 = vadd.f32 %v656_v50, %v614_v52 }
  0xf0   : > { %v769_v53 = vmax.f32 %v740_v51, 0.0 }
  0xf2   : > { %824 = vmatmul.f32.gmra.mxu0 %v769_v53 }
  0xf3   : > { %v699_v56 = vpop.f32.mrf.mxu2 }
  0xf4   : > { %v742_v54 = vpop.f32.mrf.mxu3  ;;  %v700_v57 = vadd.f32 %v699_v56, %v657_v55 }
  0xf5   : > { %v658_v59 = vpop.f32.mrf.mxu1 }
  0xf6   : > { %v743_v60 = vadd.f32 %v742_v54, %v700_v57  ;;  %v659_v4 = vadd.f32 %v658_v59, %v616_v61 }
  0xf8   : > { %v770_v63 = vmax.f32 %v743_v60, 0.0 }
  0xfa   : > { %827 = vmatmul.f32.gmra.mxu0 %v770_v63 }
  0xfb   : > { %v701_v5 = vpop.f32.mrf.mxu2 }
  0xfc   : > { %v744_v1 = vpop.f32.mrf.mxu3  ;;  %v702_v6 = vadd.f32 %v701_v5, %v659_v4 }
  0xfd   : > { %v661_v7 = vpop.f32.mrf.mxu1 }
  0xfe   : > { %v745_v9 = vadd.f32 %v744_v1, %v702_v6  ;;  %v662_v15 = vadd.f32 %v661_v7, %v619_v58 }
 0x100   : > { %v771_v11 = vmax.f32 %v745_v9, 0.0 }
 0x102   : > { %830 = vmatmul.f32.gmra.mxu0 %v771_v11 }
 0x103   : > { %v704_v16 = vpop.f32.mrf.mxu2 }
 0x104   : > { %v747_v14 = vpop.f32.mrf.mxu3  ;;  %v705_v18 = vadd.f32 %v704_v16, %v662_v15 }
 0x105   : > { %v663_v19 = vpop.f32.mrf.mxu1 }
 0x106   : > { %v748_v20 = vadd.f32 %v747_v14, %v705_v18  ;;  %v664_v23 = vadd.f32 %v663_v19, %v621_v2 }
 0x108   : > { %v772_v21 = vmax.f32 %v748_v20, 0.0 }
 0x10a   : > { %833 = vmatmul.f32.gmra.mxu0 %v772_v21 }
 0x10b   : > { %v706_v24 = vpop.f32.mrf.mxu2 }
 0x10c   : > { %v749_v22 = vpop.f32.mrf.mxu3  ;;  %v707_v25 = vadd.f32 %v706_v24, %v664_v23 }
 0x10d   : > { %v666_v26 = vpop.f32.mrf.mxu1 }
 0x10e   : > { %v750_v27 = vadd.f32 %v749_v22, %v707_v25  ;;  %v667_v29 = vadd.f32 %v666_v26, %v1789_v0 }
 0x110   : > { %v773_v10 = vmax.f32 %v750_v27, 0.0 }
 0x112   : > { %836 = vmatmul.f32.gmra.mxu0 %v773_v10 }
 0x113   : > { %v709_v30 = vpop.f32.mrf.mxu2 }
 0x114   : > { %v752_v28 = vpop.f32.mrf.mxu3  ;;  %v710_v31 = vadd.f32 %v709_v30, %v667_v29 }
 0x115   : > { %v668_v32 = vpop.f32.mrf.mxu1 }
 0x116   : > { %v753_v33 = vadd.f32 %v752_v28, %v710_v31  ;;  %v669_v62 = vadd.f32 %v668_v32, %v1806_v8 }
 0x118   : > { %v774_v34 = vmax.f32 %v753_v33, 0.0 }
 0x11a   : > { %839 = vmatmul.f32.gmra.mxu0 %v774_v34 }
 0x11b   : > { %v711_v13 = vpop.f32.mrf.mxu2 }
 0x11c   : > { %v754_v35 = vpop.f32.mrf.mxu3  ;;  %v712_v36 = vadd.f32 %v711_v13, %v669_v62 }
 0x11d   : > { %v671_v37 = vpop.f32.mrf.mxu1 }
 0x11e   : > { %v755_v38 = vadd.f32 %v754_v35, %v712_v36  ;;  %v672_v41 = vadd.f32 %v671_v37, %v1811_v12 }
 0x120   : > { %v775_v39 = vmax.f32 %v755_v38, 0.0 }
 0x122   : > { %842 = vmatmul.f32.gmra.mxu0 %v775_v39 }
 0x123   : > { %v714_v0 = vpop.f32.mrf.mxu2 }
 0x124   : > { %v757_v40 = vpop.f32.mrf.mxu3  ;;  %v715_v42 = vadd.f32 %v714_v0, %v672_v41 }
 0x125   : > { %v673_v43 = vpop.f32.mrf.mxu1 }
 0x126   : > { %v758_v44 = vadd.f32 %v757_v40, %v715_v42  ;;  %v674_v47 = vadd.f32 %v673_v43, %v1817_v17  ;;  %v1430_v17 = vld [vmem:[%s1964_s4] ss:$0 sm:$0xff] }
 0x128   : > { %v776_v45 = vmax.f32 %v758_v44, 0.0 }
 0x12a   : > { %845 = vmatmul.f32.gmra.mxu0 %v776_v45 }
 0x12b   : > { %v716_v8 = vpop.f32.mrf.mxu2 }
 0x12c   : > { %v759_v46 = vpop.f32.mrf.mxu3  ;;  %v717_v48 = vadd.f32 %v716_v8, %v674_v47 }
 0x12d   : > { %v676_v49 = vpop.f32.mrf.mxu1 }
 0x12e   : > { %v760_v50 = vadd.f32 %v759_v46, %v717_v48  ;;  %v677_v53 = vadd.f32 %v676_v49, %v1794_v3 }
 0x130   : > { %v777_v51 = vmax.f32 %v760_v50, 0.0 }
 0x132   : > { %848 = vmatmul.f32.gmra.mxu0 %v777_v51 }
 0x133   : > { %v719_v12 = vpop.f32.mrf.mxu2 }
 0x134   : > { %v762_v52 = vpop.f32.mrf.mxu3  ;;  %v720_v54 = vadd.f32 %v719_v12, %v677_v53 }
 0x135   : > { %v678_v55 = vpop.f32.mrf.mxu1 }
 0x136   : > { %v763_v56 = vadd.f32 %v762_v52, %v720_v54 }
 0x138   : > { %v778_v57 = vmax.f32 %v763_v56, 0.0 }
 0x13a   : > { %851 = vmatmul.f32.gmra.mxu0 %v778_v57 }
 0x13b   : > { %v721_v60 = vpop.f32.mrf.mxu2 }
 0x13c   : > { %v764_v59 = vpop.f32.mrf.mxu3 }
 0x157   : > { %v816_v61 = vpop.f32.mrf.mxu0 }
 0x158   : > { %v817_v63 = vadd.f32 %v1430_v17, %v816_v61 }
 0x15a   : > { %856 = vst.msk [vmem:[%s1839_s30] sm:$0xff] %vm855_vm0, %v817_v63 }
 0x15f   : > { %v819_v3 = vpop.f32.mrf.mxu0 }
 0x160   : > { %v820_v1 = vadd.f32 %v1430_v17, %v819_v3 }
 0x162   : > { %857 = vst.msk [vmem:[%s1839_s30 + $0x8] sm:$0xff] %vm855_vm0, %v820_v1 }
 0x167   : > { %v822_v4 = vpop.f32.mrf.mxu0 }
 0x168   : > { %v823_v5 = vadd.f32 %v1430_v17, %v822_v4 }
 0x16a   : > { %858 = vst.msk [vmem:[%s1839_s30 + $0x10] sm:$0xff] %vm855_vm0, %v823_v5 }
 0x16f   : > { %v825_v6 = vpop.f32.mrf.mxu0 }
 0x170   : > { %v826_v7 = vadd.f32 %v1430_v17, %v825_v6 }
 0x172   : > { %859 = vst.msk [vmem:[%s1839_s30 + $0x18] sm:$0xff] %vm855_vm0, %v826_v7 }
 0x177   : > { %v828_v9 = vpop.f32.mrf.mxu0 }
 0x178   : > { %v829_v58 = vadd.f32 %v1430_v17, %v828_v9 }
 0x17a   : > { %860 = vst.msk [vmem:[%s1839_s30 + $0x20] sm:$0xff] %vm855_vm0, %v829_v58 }
 0x17f   : > { %v831_v11 = vpop.f32.mrf.mxu0 }
 0x180   : > { %v832_v14 = vadd.f32 %v1430_v17, %v831_v11 }
 0x182   : > { %861 = vst.msk [vmem:[%s1839_s30 + $0x28] sm:$0xff] %vm855_vm0, %v832_v14 }
 0x187   : > { %v834_v15 = vpop.f32.mrf.mxu0 }
 0x188   : > { %v835_v16 = vadd.f32 %v1430_v17, %v834_v15 }
 0x18a   : > { %862 = vst.msk [vmem:[%s1839_s30 + $0x30] sm:$0xff] %vm855_vm0, %v835_v16 }
 0x18f   : > { %v837_v18 = vpop.f32.mrf.mxu0 }
 0x190   : > { %v838_v19 = vadd.f32 %v1430_v17, %v837_v18 }
 0x192   : > { %863 = vst.msk [vmem:[%s1839_s30 + $0x38] sm:$0xff] %vm855_vm0, %v838_v19 }
 0x197   : > { %v840_v20 = vpop.f32.mrf.mxu0 }
 0x198   : > { %v841_v2 = vadd.f32 %v1430_v17, %v840_v20 }
 0x19a   : > { %864 = vst.msk [vmem:[%s1839_s30 + $0x40] sm:$0xff] %vm855_vm0, %v841_v2 }
 0x19f   : > { %v843_v21 = vpop.f32.mrf.mxu0 }
 0x1a0   : > { %v844_v22 = vadd.f32 %v1430_v17, %v843_v21 }
 0x1a2   : > { %865 = vst.msk [vmem:[%s1839_s30 + $0x48] sm:$0xff] %vm855_vm0, %v844_v22 }
 0x1a7   : > { %v846_v23 = vpop.f32.mrf.mxu0 }
 0x1a8   : > { %v847_v24 = vadd.f32 %v1430_v17, %v846_v23 }
 0x1aa   : > { %866 = vst.msk [vmem:[%s1839_s30 + $0x50] sm:$0xff] %vm855_vm0, %v847_v24 }
 0x1af   : > { %v849_v25 = vpop.f32.mrf.mxu0 }
 0x1b0   : > { %v850_v26 = vadd.f32 %v1430_v17, %v849_v25 }
 0x1b2   : > { %867 = vst.msk [vmem:[%s1839_s30 + $0x58] sm:$0xff] %vm855_vm0, %v850_v26 }
 0x1b6   : > { %875 = sbr.rel (!%p1580_p4) target bundleno = 503 (0x1f7), region = 44 }
 0x1b7   : > { %v852_v27 = vpop.f32.mrf.mxu0 }
 0x1b8   : > { %v853_v10 = vadd.f32 %v1430_v17, %v852_v27 }
 0x1ba   : > { %868 = vst.msk [vmem:[%s1839_s30 + $0x60] sm:$0xff] %vm855_vm0, %v853_v10 }
 0x1bb   : > { %s1976_s18 = smov (!%p878_p8, %s877_s18), 13 }
 0x1bc   : > { %s1269_s10 = sshll.u32 %s1976_s18, 3 }
 0x1bd   : > { %p1272_p9 = scmp.eq.s32.totalorder %s1269_s10, 0 }
 0x1be   : > { %1431 = sdivrem.u32 (!%p1272_p9), %s1976_s18, 13 }
 0x1bf   : > { %886 = sbr.rel (%p1272_p9) target bundleno = 503 (0x1f7), region = 48 }
 0x1c7   : > { %s1880_s26 = spop.drf %1431 }
 0x1c8   : > { %s1433_s11 = spop.drf %1431  ;;  %p1273_p10 = scmp.le.s32.totalorder %s1880_s26, 0 }
 0x1c9   : > { %s1967_s21 = smov (!%p1273_p10), %s1874_s9  ;;  %s1968_s8 = smov (!%p1273_p10), %s1839_s30 }
 0x1ca   : > { %1091 = sbr.rel (%p1273_p10) target bundleno = 477 (0x1dd), region = 124  ;;  %s1889_s12 = smov (!%p1273_p10), 0  }
 0x1cb   : > { %s1891_s13 = smov (!%p1273_p10), 0  }
 0x1cf LB: >> { %v975_v28 = vld [vmem:[%s1499_s8] sm:$0xff]  ;;  %v977_v29 = vld [vmem:[%s1499_s8 + $0x8] sm:$0xff]  ;;  %v979_v30 = vld [vmem:[%s1499_s8 + $0x10] sm:$0xff]  ;;  %s1001_s14 = sadd.s32 1, %s1503_s12  ;;  %s969_s13 = sadd.s32 1, %s1507_s13   ;;  %s1507_s13 = sphi %s1891_s13, %s969_s13   ;;  %s1503_s12 = sphi %s1889_s12, %s1971_s12   ;;  %s1499_s8 = sphi %s1968_s8, %s1970_s8   ;;  %s1495_s21 = sphi %s1967_s21, %s1969_s21  }
 0x1d0   : >> { %976 = vst [vmem:[%s1495_s21] sm:$0xff] %v975_v28  ;;  %v981_v31 = vld [vmem:[%s1499_s8 + $0x18] sm:$0xff]  ;;  %p1002_p11 = scmp.ge.s32.totalorder %s1001_s14, %s1880_s26  ;;  %v983_v32 = vld [vmem:[%s1499_s8 + $0x20] sm:$0xff]  ;;  %v985_v33 = vld [vmem:[%s1499_s8 + $0x28] sm:$0xff]  ;;  %p968_p12 = scmp.ge.s32.totalorder %s969_s13, %s1880_s26 }
 0x1d1   : >> { %978 = vst [vmem:[%s1495_s21 + $0x8] sm:$0xff] %v977_v29  ;;  %v987_v34 = vld [vmem:[%s1499_s8 + $0x30] sm:$0xff]  ;;  %v989_v35 = vld [vmem:[%s1499_s8 + $0x38] sm:$0xff]  ;;  %v991_v62 = vld [vmem:[%s1499_s8 + $0x40] sm:$0xff] }
 0x1d2   : >> { %980 = vst [vmem:[%s1495_s21 + $0x10] sm:$0xff] %v979_v30  ;;  %s1978_s14 = smov (%p1002_p11, %s1001_s14), 0  ;;  %v993_v13 = vld [vmem:[%s1499_s8 + $0x48] sm:$0xff]  ;;  %v995_v36 = vld [vmem:[%s1499_s8 + $0x50] sm:$0xff]  ;;  %v997_v37 = vld [vmem:[%s1499_s8 + $0x58] sm:$0xff] }
 0x1d3   : >> { %982 = vst [vmem:[%s1495_s21 + $0x18] sm:$0xff] %v981_v31  ;;  %s1004_s15 = smul.u32 104, %s1978_s14  ;;  %v999_v38 = vld [vmem:[%s1499_s8 + $0x60] sm:$0xff]  ;;  %s1971_s12 = smov %s1978_s14 }
 0x1d4   : >> { %984 = vst [vmem:[%s1495_s21 + $0x20] sm:$0xff] %v983_v32 }
 0x1d5   : >> { %986 = vst [vmem:[%s1495_s21 + $0x28] sm:$0xff] %v985_v33  ;;  %s1006_s16 = scalar_lea.vmem %s1839_s30, %s1004_s15 [#allocation2]   ;;  %s1007_s17 = scalar_lea.vmem %s1874_s9, %s1004_s15  }
 0x1d6   : >> { %988 = vst [vmem:[%s1495_s21 + $0x30] sm:$0xff] %v987_v34  ;;  %s1970_s8 = smov %s1006_s16 }
 0x1d7   : >> { %990 = vst [vmem:[%s1495_s21 + $0x38] sm:$0xff] %v989_v35 }
 0x1d8   : >> { %992 = vst [vmem:[%s1495_s21 + $0x40] sm:$0xff] %v991_v62  ;;  %971 = sbr.rel (!%p968_p12) target bundleno = 463 (0x1cf), region = 130 }
 0x1d9   : >> { %994 = vst [vmem:[%s1495_s21 + $0x48] sm:$0xff] %v993_v13 }
 0x1da   : >> { %996 = vst [vmem:[%s1495_s21 + $0x50] sm:$0xff] %v995_v36 }
 0x1db   : >> { %998 = vst [vmem:[%s1495_s21 + $0x58] sm:$0xff] %v997_v37 }
 0x1dc   : >> { %1000 = vst [vmem:[%s1495_s21 + $0x60] sm:$0xff] %v999_v38  ;;  %s1969_s21 = smov %s1007_s17 }
 0x1dd PF: > { %1434 = sdivrem.u32 %s1976_s18, 13 }
 0x1de   : > { %s1274_s20 = smul.u32 104, %s1880_s26 }
 0x1e0   : > { %s1945_s23 = scalar_lea.vmem %s1839_s30, %s1274_s20 [#allocation2]   ;;  %s1014_s24 = scalar_lea.vmem %s1874_s9, %s1274_s20  }
 0x1e6   : > { %s1435_s28 = spop.drf %1434 }
 0x1e7   : > { %s1436_s29 = spop.drf %1434 }
 0x1e8   : > { %p1276_p13 = scmp.le.s32.totalorder %s1436_s29, 0 }
 0x1e9   : > { %s1509_s6 = smov (!%p1276_p13), %s1014_s24   ;;  %s1513_s27 = smov (!%p1276_p13), %s1945_s23  }
 0x1ea   : > { %1105 = sbr.rel (%p1276_p13) target bundleno = 503 (0x1f7), region = 135  ;;  %s1517_s7 = smov (!%p1276_p13), 0  }
 0x1eb   : > { %s1521_s10 = smov (!%p1276_p13), 0  }
 0x1ef LB: >> { %v1024_v39 = vld [vmem:[%s1515_s27] sm:$0xff]  ;;  %s1026_s30 = sadd.s32 1, %s1519_s7  ;;  %s1018_s10 = sadd.s32 1, %s1523_s10   ;;  %s1523_s10 = sphi %s1521_s10, %s1018_s10   ;;  %s1519_s7 = sphi %s1517_s7, %s1518_s7   ;;  %s1515_s27 = sphi %s1513_s27, %s1031_s27   ;;  %s1511_s6 = sphi %s1509_s6, %s1032_s6  }
 0x1f0   : >> { %1025 = vst [vmem:[%s1511_s6] sm:$0xff] %v1024_v39  ;;  %p1027_p0 = scmp.ge.s32.totalorder %s1026_s30, %s1436_s29  ;;  %p1017_p1 = scmp.ge.s32.totalorder %s1018_s10, %s1436_s29 }
 0x1f2   : >> { %s1980_s30 = smov (%p1027_p0, %s1026_s30), 0  ;;  %1020 = sbr.rel (!%p1017_p1) target bundleno = 495 (0x1ef), region = 141 }
 0x1f3   : >> { %s1277_s18 = sshll.u32 %s1980_s30, 3  ;;  %s1518_s7 = smov %s1980_s30  }
 0x1f4   : >> { %s1031_s27 = scalar_lea.vmem %s1945_s23, %s1277_s18 [#allocation2]   ;;  %s1032_s6 = scalar_lea.vmem %s1014_s24, %s1277_s18  }
 0x1f7 PF: > { %p12_p2 = scmp.ge.s32.totalorder %s1570_s22, 4   ;;  %s1972_s18 = smov %s1487_s19 }
 0x1f8   : > { %s1973_s19 = smov %s1578_s25  ;;  %s1974_s20 = smov %s1570_s22 }
 0x1f9   :  { %14 = sbr.rel (!%p12_p2) target bundleno = 2 (0x2), region = 152 }

</bundles_post_ra>
